<compile_context>
chip_gen: v5e
topology: v5e:2x2
jax: 0.10.0
libtpu: 0.0.40
codegen_flags: <defaults>
</compile_context>

<pallas_src>
from typing import NamedTuple, Optional

import jax
import jax.numpy as jnp
from jax.experimental import pallas as pl
from jax.experimental.pallas import tpu as pltpu

_LANE = 128  # TPU lane width (last dim)


def _round_up(n, m):
    return ((n + m - 1) // m) * m


def _sublane_rows(dtype):
    """Rows packed per vreg for this operand dtype (8 f32, 16 bf16, 32 int8/fp8)."""
    return max(8, 32 // jnp.dtype(dtype).itemsize)


def _pad2(a, rows, cols):
    pr, pc = rows - a.shape[0], cols - a.shape[1]
    if pr or pc:
        a = jnp.pad(a, ((0, pr), (0, pc)))
    return a


class PerceptronParams(NamedTuple):
    w1_p: jax.Array      # (F_in_p, H_p)  operand dtype
    b1_p: jax.Array      # (1, H_p)       f32
    w2_p: jax.Array      # (H_p, F_out_p) operand dtype
    b2_p: jax.Array      # (1, F_out_p)   f32
    f_in: int
    hidden: int
    f_out: int


def prepare_params(w1, b1, w2, b2, *, mxu_dtype: Optional[jnp.dtype] = None):
    """Pad weights/biases once to lane-dense (multiple-of-128) layout.

    Zero padding is exact: padded W2 rows are zero, so sigmoid(0)=0.5 in padded
    hidden columns contributes nothing; padded output columns are sliced off.
    """
    f_in, hidden = w1.shape
    hidden2, f_out = w2.shape
    assert hidden == hidden2, "shape mismatch between layer1 and layer2"
    op_dtype = jnp.dtype(mxu_dtype) if mxu_dtype is not None else jnp.dtype(w1.dtype)

    f_in_p = _round_up(f_in, _LANE)
    h_p = _round_up(hidden, _LANE)
    f_out_p = _round_up(f_out, _LANE)

    w1_p = _pad2(w1.astype(op_dtype), f_in_p, h_p)
    w2_p = _pad2(w2.astype(op_dtype), h_p, f_out_p)
    b1_p = _pad2(b1.reshape(1, hidden).astype(jnp.float32), 1, h_p)
    b2_p = _pad2(b2.reshape(1, f_out).astype(jnp.float32), 1, f_out_p)
    return PerceptronParams(w1_p, b1_p, w2_p, b2_p, f_in, hidden, f_out)


def _perceptron_kernel(x_ref, w1_ref, b1_ref, w2_ref, b2_ref, o_ref):
    # Layer 1: MXU matmul with f32 accumulation, f32 bias add, EUP sigmoid.
    h = jnp.dot(x_ref[...], w1_ref[...], preferred_element_type=jnp.float32)
    h = jax.nn.sigmoid(h + b1_ref[...])
    # Layer 2: cast activations to the MXU operand dtype, accumulate in f32.
    y = jnp.dot(h.astype(w2_ref.dtype), w2_ref[...],
                preferred_element_type=jnp.float32)
    o_ref[...] = (y + b2_ref[...]).astype(o_ref.dtype)


def _physical_vmem_bytes():
    try:
        return int(pltpu.get_tpu_info().vmem_capacity_bytes)
    except Exception:
        return 64 << 20  # conservative (v7x-sized) fallback


def perceptron_forward(x, params: PerceptronParams, *, block_b=512, x_buffers=2):
    """x: (B, F_in) -> (B, F_out), using pre-padded params from prepare_params()."""
    B, f_in = x.shape
    assert f_in == params.f_in, "shape mismatch"
    out_dtype = x.dtype
    op_dtype = params.w1_p.dtype

    f_in_p, h_p = params.w1_p.shape
    _, f_out_p = params.w2_p.shape

    # --- batch tiling ------------------------------------------------------
    sub = _sublane_rows(op_dtype)
    if B >= 2 * sub:
        # Aim for >= 2 grid steps so the "parallel" batch axis can shard across
        # both v7x TensorCores even when B <= block_b.
        tb_cap = _round_up(pl.cdiv(B, 2), sub)
    else:
        tb_cap = _round_up(B, sub)
    TB = max(sub, min(_round_up(block_b, sub), tb_cap))
    B_p = _round_up(B, TB)

    # --- pad x only if actually required ------------------------------------
    x_in = x.astype(op_dtype) if x.dtype != op_dtype else x
    if (B, f_in) != (B_p, f_in_p):
        x_in = _pad2(x_in, B_p, f_in_p)

    # --- VMEM budget (single-buffered weights; no double-counted factor) ----
    op_isz = jnp.dtype(op_dtype).itemsize
    out_isz = jnp.dtype(out_dtype).itemsize
    resident = (f_in_p * h_p + h_p * f_out_p) * op_isz + (h_p + f_out_p) * 4
    streamed = x_buffers * TB * f_in_p * op_isz + 2 * TB * f_out_p * out_isz
    work = TB * h_p * 4 + TB * f_out_p * 4          # f32 h and y intermediates
    need = resident + streamed + work + (8 << 20)   # + Mosaic internal scratch
    cap = max(32 << 20, _physical_vmem_bytes() - (12 << 20))  # leave headroom
    vmem_limit = int(min(max(need, 32 << 20), cap))

    grid = (B_p // TB,)

    def _run(use_pipeline_modes):
        if use_pipeline_modes:
            res_kw = dict(pipeline_mode=pl.Buffered(1))          # VMEM-resident
            x_kw = dict(pipeline_mode=pl.Buffered(x_buffers))    # streamed
        else:
            res_kw, x_kw = {}, {}
        in_specs = [
            pl.BlockSpec((TB, f_in_p), lambda i: (i, 0), **x_kw),     # x tile
            pl.BlockSpec((f_in_p, h_p), lambda i: (0, 0), **res_kw),  # W1
            pl.BlockSpec((1, h_p), lambda i: (0, 0), **res_kw),       # b1
            pl.BlockSpec((h_p, f_out_p), lambda i: (0, 0), **res_kw),  # W2
            pl.BlockSpec((1, f_out_p), lambda i: (0, 0), **res_kw),    # b2
        ]
        return pl.pallas_call(
            _perceptron_kernel,
            out_shape=jax.ShapeDtypeStruct((B_p, f_out_p), out_dtype),
            grid_spec=pltpu.PrefetchScalarGridSpec(
                num_scalar_prefetch=0,
                grid=grid,
                in_specs=in_specs,
                out_specs=pl.BlockSpec((TB, f_out_p), lambda i: (i, 0)),
            ),
            compiler_params=pltpu.CompilerParams(
                dimension_semantics=("parallel",),
                vmem_limit_bytes=vmem_limit,
            ),
        )(x_in, params.w1_p, params.b1_p, params.w2_p, params.b2_p)

    try:
        out_p = _run(True)
    except Exception:
        # Fallback if this JAX version rejects pipeline_mode / pl.Buffered.
        out_p = _run(False)

    if (B_p, f_out_p) != (B, params.f_out):
        out_p = out_p[:B, :params.f_out]
    return out_p


def perceptron_ref(x, w1, b1, w2, b2):
    h = jax.nn.sigmoid(x @ w1 + b1)
    return h @ w2 + b2


if __name__ == "__main__":
    # Small shapes consistent with the module: (B, in) -> (B, hidden) -> (B, out)
    B, F_IN, HID, F_OUT = 2, 16, 32, 8

    key = jax.random.PRNGKey(0)
    kx, kw1, kb1, kw2, kb2 = jax.random.split(key, 5)

    x = jax.random.normal(kx, (B, F_IN), dtype=jnp.float32)
    # torch.randn -> standard normal init, done deterministically in-script.
    w1 = jax.random.normal(kw1, (F_IN, HID), dtype=jnp.float32)
    b1 = jax.random.normal(kb1, (HID,), dtype=jnp.float32)
    w2 = jax.random.normal(kw2, (HID, F_OUT), dtype=jnp.float32)
    b2 = jax.random.normal(kb2, (F_OUT,), dtype=jnp.float32)

    ref = perceptron_ref(x, w1, b1, w2, b2)

    # f32 MXU operands: faithful to the module semantics (tight tolerance).
    params_f32 = prepare_params(w1, b1, w2, b2)
    out = jax.block_until_ready(perceptron_forward(x, params_f32))
    assert out.shape == (B, F_OUT)
    assert jnp.allclose(out, ref, atol=1e-4, rtol=1e-4), "f32 kernel mismatch vs reference"

    # bf16 MXU operands (v5e/v6e/v7x fast path); precision intentionally relaxed.
    params_bf16 = prepare_params(w1, b1, w2, b2, mxu_dtype=jnp.bfloat16)
    out_bf16 = jax.block_until_ready(perceptron_forward(x, params_bf16))
    assert out_bf16.shape == (B, F_OUT)
    assert jnp.allclose(out_bf16, ref, atol=1e-1, rtol=1e-1), "bf16 kernel mismatch vs reference"

    print("KERNEL_OK")
</pallas_src>

<mosaic_0001>
module attributes {stable_mosaic.version = 11 : i64} {
  func.func @_perceptron_kernel(%arg0: i32, %arg1: memref<8x128xf32, #tpu.memory_space<vmem>>, %arg2: memref<128x128xf32, #tpu.memory_space<vmem>>, %arg3: memref<1x128xf32, #tpu.memory_space<vmem>>, %arg4: memref<128x128xf32, #tpu.memory_space<vmem>>, %arg5: memref<1x128xf32, #tpu.memory_space<vmem>>, %arg6: memref<8x128xf32, #tpu.memory_space<vmem>>) attributes {dimension_semantics = [#tpu.dimension_semantics<parallel>], iteration_bounds = array<i64: 1>, scalar_prefetch = 0 : i64, scratch_operands = 0 : i64, tpu.core_type = #tpu.core_type<tc>, window_params = [{pipeline_mode = #tpu.pipeline_mode<double_buffered>, transform_indices = @transform_0, window_bounds = array<i64: 8, 128>}, {pipeline_mode = #tpu.pipeline_mode<synchronous>, transform_indices = @transform_1, window_bounds = array<i64: 128, 128>}, {pipeline_mode = #tpu.pipeline_mode<synchronous>, transform_indices = @transform_2, window_bounds = array<i64: 1, 128>}, {pipeline_mode = #tpu.pipeline_mode<synchronous>, transform_indices = @transform_3, window_bounds = array<i64: 128, 128>}, {pipeline_mode = #tpu.pipeline_mode<synchronous>, transform_indices = @transform_4, window_bounds = array<i64: 1, 128>}, {transform_indices = @transform_5, window_bounds = array<i64: 8, 128>}]} {
    %c0 = arith.constant 0 : index
    %c0_0 = arith.constant 0 : index
    %0 = vector.load %arg1[%c0, %c0_0] : memref<8x128xf32, #tpu.memory_space<vmem>>, vector<8x128xf32>
    %c0_1 = arith.constant 0 : index
    %c0_2 = arith.constant 0 : index
    %1 = vector.load %arg2[%c0_1, %c0_2] : memref<128x128xf32, #tpu.memory_space<vmem>>, vector<128x128xf32>
    %cst = arith.constant dense<0.000000e+00> : vector<8x128xf32>
    %2 = tpu.matmul %0, %1, %cst {dimension_numbers = #tpu.dot_dimension_numbers<[1], [0], [0], [1], [0, 0, 1, 1], [], []>} : vector<8x128xf32>, vector<128x128xf32>, vector<8x128xf32> -> vector<8x128xf32>
    %c0_3 = arith.constant 0 : index
    %c0_4 = arith.constant 0 : index
    %3 = vector.load %arg3[%c0_3, %c0_4] : memref<1x128xf32, #tpu.memory_space<vmem>>, vector<1x128xf32>
    %4 = vector.broadcast %3 : vector<1x128xf32> to vector<8x128xf32>
    %5 = arith.addf %2, %4 : vector<8x128xf32>
    %6 = arith.negf %5 : vector<8x128xf32>
    %7 = math.exp %6 : vector<8x128xf32>
    %cst_5 = arith.constant 1.000000e+00 : f32
    %8 = vector.broadcast %cst_5 : f32 to vector<8x128xf32>
    %9 = arith.addf %8, %7 : vector<8x128xf32>
    %10 = arith.divf %8, %9 : vector<8x128xf32>
    %c0_6 = arith.constant 0 : index
    %c0_7 = arith.constant 0 : index
    %11 = vector.load %arg4[%c0_6, %c0_7] : memref<128x128xf32, #tpu.memory_space<vmem>>, vector<128x128xf32>
    %cst_8 = arith.constant dense<0.000000e+00> : vector<8x128xf32>
    %12 = tpu.matmul %10, %11, %cst_8 {dimension_numbers = #tpu.dot_dimension_numbers<[1], [0], [0], [1], [0, 0, 1, 1], [], []>} : vector<8x128xf32>, vector<128x128xf32>, vector<8x128xf32> -> vector<8x128xf32>
    %c0_9 = arith.constant 0 : index
    %c0_10 = arith.constant 0 : index
    %13 = vector.load %arg5[%c0_9, %c0_10] : memref<1x128xf32, #tpu.memory_space<vmem>>, vector<1x128xf32>
    %14 = vector.broadcast %13 : vector<1x128xf32> to vector<8x128xf32>
    %15 = arith.addf %12, %14 : vector<8x128xf32>
    %c0_11 = arith.constant 0 : index
    %c0_12 = arith.constant 0 : index
    %16 = vector.load %arg6[%c0_11, %c0_12] : memref<8x128xf32, #tpu.memory_space<vmem>>, vector<8x128xf32>
    tpu.vector_store %arg6[%c0_11, %c0_12], %15 {strides = array<i32>} : memref<8x128xf32, #tpu.memory_space<vmem>>, vector<8x128xf32>,
    return
  }
  func.func @transform_0(%arg0: i32) -> (i32, i32) {
    %c0_i32 = arith.constant 0 : i32
    %c0_i32_0 = arith.constant 0 : i32
    return %arg0, %c0_i32 : i32, i32
  }
  func.func @transform_1(%arg0: i32) -> (i32, i32) {
    %c0_i32 = arith.constant 0 : i32
    %c0_i32_0 = arith.constant 0 : i32
    %c0_i32_1 = arith.constant 0 : i32
    return %c0_i32, %c0_i32_0 : i32, i32
  }
  func.func @transform_2(%arg0: i32) -> (i32, i32) {
    %c0_i32 = arith.constant 0 : i32
    %c0_i32_0 = arith.constant 0 : i32
    %c0_i32_1 = arith.constant 0 : i32
    return %c0_i32, %c0_i32_0 : i32, i32
  }
  func.func @transform_3(%arg0: i32) -> (i32, i32) {
    %c0_i32 = arith.constant 0 : i32
    %c0_i32_0 = arith.constant 0 : i32
    %c0_i32_1 = arith.constant 0 : i32
    return %c0_i32, %c0_i32_0 : i32, i32
  }
  func.func @transform_4(%arg0: i32) -> (i32, i32) {
    %c0_i32 = arith.constant 0 : i32
    %c0_i32_0 = arith.constant 0 : i32
    %c0_i32_1 = arith.constant 0 : i32
    return %c0_i32, %c0_i32_0 : i32, i32
  }
  func.func @transform_5(%arg0: i32) -> (i32, i32) {
    %c0_i32 = arith.constant 0 : i32
    %c0_i32_0 = arith.constant 0 : i32
    return %arg0, %c0_i32 : i32, i32
  }
}

module attributes {stable_mosaic.version = 11 : i64} {
  func.func @_perceptron_kernel(%arg0: i32, %arg1: memref<8x128xf32, #tpu.memory_space<vmem>>, %arg2: memref<128x128xf32, #tpu.memory_space<vmem>>, %arg3: memref<1x128xf32, #tpu.memory_space<vmem>>, %arg4: memref<128x128xf32, #tpu.memory_space<vmem>>, %arg5: memref<1x128xf32, #tpu.memory_space<vmem>>, %arg6: memref<8x128xf32, #tpu.memory_space<vmem>>) attributes {dimension_semantics = [#tpu.dimension_semantics<parallel>], iteration_bounds = array<i64: 1>, scalar_prefetch = 0 : i64, scratch_operands = 0 : i64, tpu.core_type = #tpu.core_type<tc>, window_params = [{transform_indices = @transform_0, window_bounds = array<i64: 8, 128>}, {pipeline_mode = #tpu.pipeline_mode<synchronous>, transform_indices = @transform_1, window_bounds = array<i64: 128, 128>}, {pipeline_mode = #tpu.pipeline_mode<synchronous>, transform_indices = @transform_2, window_bounds = array<i64: 1, 128>}, {pipeline_mode = #tpu.pipeline_mode<synchronous>, transform_indices = @transform_3, window_bounds = array<i64: 128, 128>}, {pipeline_mode = #tpu.pipeline_mode<synchronous>, transform_indices = @transform_4, window_bounds = array<i64: 1, 128>}, {transform_indices = @transform_5, window_bounds = array<i64: 8, 128>}]} {
    %c0 = arith.constant 0 : index
    %c0_0 = arith.constant 0 : index
    %0 = vector.load %arg1[%c0, %c0_0] : memref<8x128xf32, #tpu.memory_space<vmem>>, vector<8x128xf32>
    %c0_1 = arith.constant 0 : index
    %c0_2 = arith.constant 0 : index
    %1 = vector.load %arg2[%c0_1, %c0_2] : memref<128x128xf32, #tpu.memory_space<vmem>>, vector<128x128xf32>
    %cst = arith.constant dense<0.000000e+00> : vector<8x128xf32>
    %2 = tpu.matmul %0, %1, %cst {dimension_numbers = #tpu.dot_dimension_numbers<[1], [0], [0], [1], [0, 0, 1, 1], [], []>} : vector<8x128xf32>, vector<128x128xf32>, vector<8x128xf32> -> vector<8x128xf32>
    %c0_3 = arith.constant 0 : index
    %c0_4 = arith.constant 0 : index
    %3 = vector.load %arg3[%c0_3, %c0_4] : memref<1x128xf32, #tpu.memory_space<vmem>>, vector<1x128xf32>
    %4 = vector.broadcast %3 : vector<1x128xf32> to vector<8x128xf32>
    %5 = arith.addf %2, %4 : vector<8x128xf32>
    %6 = arith.negf %5 : vector<8x128xf32>
    %7 = math.exp %6 : vector<8x128xf32>
    %cst_5 = arith.constant 1.000000e+00 : f32
    %8 = vector.broadcast %cst_5 : f32 to vector<8x128xf32>
    %9 = arith.addf %8, %7 : vector<8x128xf32>
    %10 = arith.divf %8, %9 : vector<8x128xf32>
    %c0_6 = arith.constant 0 : index
    %c0_7 = arith.constant 0 : index
    %11 = vector.load %arg4[%c0_6, %c0_7] : memref<128x128xf32, #tpu.memory_space<vmem>>, vector<128x128xf32>
    %cst_8 = arith.constant dense<0.000000e+00> : vector<8x128xf32>
    %12 = tpu.matmul %10, %11, %cst_8 {dimension_numbers = #tpu.dot_dimension_numbers<[1], [0], [0], [1], [0, 0, 1, 1], [], []>} : vector<8x128xf32>, vector<128x128xf32>, vector<8x128xf32> -> vector<8x128xf32>
    %c0_9 = arith.constant 0 : index
    %c0_10 = arith.constant 0 : index
    %13 = vector.load %arg5[%c0_9, %c0_10] : memref<1x128xf32, #tpu.memory_space<vmem>>, vector<1x128xf32>
    %14 = vector.broadcast %13 : vector<1x128xf32> to vector<8x128xf32>
    %15 = arith.addf %12, %14 : vector<8x128xf32>
    %c0_11 = arith.constant 0 : index
    %c0_12 = arith.constant 0 : index
    %16 = vector.load %arg6[%c0_11, %c0_12] : memref<8x128xf32, #tpu.memory_space<vmem>>, vector<8x128xf32>
    tpu.vector_store %arg6[%c0_11, %c0_12], %15 {strides = array<i32>} : memref<8x128xf32, #tpu.memory_space<vmem>>, vector<8x128xf32>,
    return
  }
  func.func @transform_0(%arg0: i32) -> (i32, i32) {
    %c0_i32 = arith.constant 0 : i32
    %c0_i32_0 = arith.constant 0 : i32
    return %arg0, %c0_i32 : i32, i32
  }
  func.func @transform_1(%arg0: i32) -> (i32, i32) {
    %c0_i32 = arith.constant 0 : i32
    %c0_i32_0 = arith.constant 0 : i32
    %c0_i32_1 = arith.constant 0 : i32
    return %c0_i32, %c0_i32_0 : i32, i32
  }
  func.func @transform_2(%arg0: i32) -> (i32, i32) {
    %c0_i32 = arith.constant 0 : i32
    %c0_i32_0 = arith.constant 0 : i32
    %c0_i32_1 = arith.constant 0 : i32
    return %c0_i32, %c0_i32_0 : i32, i32
  }
  func.func @transform_3(%arg0: i32) -> (i32, i32) {
    %c0_i32 = arith.constant 0 : i32
    %c0_i32_0 = arith.constant 0 : i32
    %c0_i32_1 = arith.constant 0 : i32
    return %c0_i32, %c0_i32_0 : i32, i32
  }
  func.func @transform_4(%arg0: i32) -> (i32, i32) {
    %c0_i32 = arith.constant 0 : i32
    %c0_i32_0 = arith.constant 0 : i32
    %c0_i32_1 = arith.constant 0 : i32
    return %c0_i32, %c0_i32_0 : i32, i32
  }
  func.func @transform_5(%arg0: i32) -> (i32, i32) {
    %c0_i32 = arith.constant 0 : i32
    %c0_i32_0 = arith.constant 0 : i32
    return %arg0, %c0_i32 : i32, i32
  }
}

</mosaic_0001>

<bundles_post_ra>
// kernel: tpu_custom_call.1
= control target key start
LH: loop header
LB: loop body
LE: loop exit
PB: predicated region body
PF: predicated region fallthrough
CT: control target
= control target key end

     0   :  { %10 = vsyncpa [#allocation3], 0  ;;  %s354_s0 = inlined_call_operand.hbm [shape: f32[8,128], index: 0, kind: input, shape index: {}]   ;;  %s355_s1 = inlined_call_operand.hbm [shape: f32[128,128], index: 1, kind: input, shape index: {}]   ;;  %s356_s2 = inlined_call_operand.vmem [shape: f32[1,128], index: 2, kind: input, shape index: {}]   ;;  %s357_s3 = inlined_call_operand.hbm [shape: f32[128,128], index: 3, kind: input, shape index: {}]   ;;  %s358_s4 = inlined_call_operand.vmem [shape: f32[1,128], index: 4, kind: input, shape index: {}]   ;;  %s359_s5 = inlined_call_operand.hbm [shape: f32[8,128], index: 5, kind: output, shape index: {}]  }
   0x1   :  { %11 = vsyncpa [#allocation6], 0  ;;  %s28_s20 = sshll.u32 %s355_s1, 4  ;;  %s29_s20 = int_to_ptr.hbm [resolvable:$true] %s28_s20 }
   0x2   :  { %12 = vsyncpa [#allocation4], 0  ;;  %s300_s21 = smov [#allocation5]   ;;  %s18_s25 = sshll.u32 %s354_s0, 4  ;;  %s19_s25 = int_to_ptr.hbm [resolvable:$true] %s18_s25 }
   0x3   :  { %s30_s22 = sshll.u32 %s300_s21, 4  ;;  %s301_s26 = smov 128   ;;  %s31_s22 = int_to_ptr.vmem [resolvable:$true] %s30_s22 }
   0x4   :  { %s302_s27 = smov 8   ;;  %s303_s28 = smov [#allocation2]  }
   0x5   :  { %36 = dma.hbm_to_vmem [thread:$0]  %s29_s20, 2048, %s31_s22, [#allocation6], %s301_s26, %s301_s26, %s302_s27  }
   0x6   :  { %s20_s29 = sshll.u32 %s303_s28, 4  ;;  %s43_s7 = sshll.u32 %s357_s3, 4  ;;  %s21_s29 = int_to_ptr.vmem [resolvable:$true] %s20_s29  ;;  %s44_s7 = int_to_ptr.hbm [resolvable:$true] %s43_s7 }
   0x7   :  { %23 = dma.hbm_to_vmem [thread:$0]  %s19_s25, 128, %s21_s29, [#allocation3]  }
   0x8   :  { %s304_s1 = smov [#allocation7]  }
   0x9   :  { %s45_s8 = sshll.u32 %s304_s1, 4  ;;  %s46_s8 = int_to_ptr.vmem [resolvable:$true] %s45_s8 }
   0xa   :  { %51 = dma.hbm_to_vmem [thread:$0]  %s44_s7, 2048, %s46_s8, [#allocation6], %s301_s26, %s301_s26, %s302_s27  }
   0xb   :  { %294 = dma.done.wait [#allocation3], 128  }
   0xc   :  { %295 = vsyncadd [#allocation3], 4294967168 }
   0xd   :  { %296 = dma.done.wait [#allocation6], 4096  }
   0xe   :  { %297 = vsyncadd [#allocation6], 4294963200  ;;  %v82_v0 = vld [vmem:[#allocation5 + $0x78] sm:$0xff]  ;;  %v81_v1 = vld [vmem:[#allocation5 + $0x70] sm:$0xff]  ;;  %s305_s10 = smov [#allocation8]   ;;  %s174_s14 = sshll.u32 %s359_s5, 4  ;;  %s175_s14 = int_to_ptr.hbm [resolvable:$true] %s174_s14 }
   0xf   :  { %87 = vmatpush.msra.mxu0 %v82_v0  ;;  %v80_v2 = vld [vmem:[#allocation5 + $0x68] sm:$0xff]  ;;  %v79_v3 = vld [vmem:[#allocation5 + $0x60] sm:$0xff]  ;;  %v78_v4 = vld [vmem:[#allocation5 + $0x58] sm:$0xff]  ;;  %s172_s11 = sshll.u32 %s305_s10, 4  ;;  %s173_s11 = int_to_ptr.vmem [resolvable:$true] %s172_s11 }
  0x10   :  { %v77_v5 = vld [vmem:[#allocation5 + $0x50] sm:$0xff]  ;;  %v76_v6 = vld [vmem:[#allocation5 + $0x48] sm:$0xff]  ;;  %v75_v7 = vld [vmem:[#allocation5 + $0x40] sm:$0xff] }
  0x11   :  { %88 = vmatpush.msra.mxu0 %v81_v1  ;;  %v74_v8 = vld [vmem:[#allocation5 + $0x38] sm:$0xff]  ;;  %v73_v9 = vld [vmem:[#allocation5 + $0x30] sm:$0xff]  ;;  %v72_v10 = vld [vmem:[#allocation5 + $0x28] sm:$0xff] }
  0x12   :  { %v71_v11 = vld [vmem:[#allocation5 + $0x20] sm:$0xff]  ;;  %v70_v12 = vld [vmem:[#allocation5 + $0x18] sm:$0xff]  ;;  %v69_v13 = vld [vmem:[#allocation5 + $0x10] sm:$0xff] }
  0x13   :  { %89 = vmatpush.msra.mxu0 %v80_v2  ;;  %v68_v14 = vld [vmem:[#allocation5 + $0x8] sm:$0xff]  ;;  %v67_v15 = vld [vmem:[#allocation5] sm:$0xff]  ;;  %v66_v16 = vld [vmem:[#allocation2] sm:$0xff] }
  0x14   :  { %v141_v17 = vld [vmem:[#allocation7 + $0x78] sm:$0xff]  ;;  %v140_v18 = vld [vmem:[#allocation7 + $0x70] sm:$0xff]  ;;  %v139_v19 = vld [vmem:[#allocation7 + $0x68] sm:$0xff] }
  0x15   :  { %90 = vmatpush.msra.mxu0 %v79_v3  ;;  %146 = vmatpush.msra.mxu1 %v141_v17  ;;  %v138_v20 = vld [vmem:[#allocation7 + $0x60] sm:$0xff]  ;;  %v137_v21 = vld [vmem:[#allocation7 + $0x58] sm:$0xff]  ;;  %v136_v22 = vld [vmem:[#allocation7 + $0x50] sm:$0xff] }
  0x16   :  { %v135_v23 = vld [vmem:[#allocation7 + $0x48] sm:$0xff]  ;;  %v134_v24 = vld [vmem:[#allocation7 + $0x40] sm:$0xff]  ;;  %v133_v25 = vld [vmem:[#allocation7 + $0x38] sm:$0xff] }
  0x17   :  { %91 = vmatpush.msra.mxu0 %v78_v4  ;;  %147 = vmatpush.msra.mxu1 %v140_v18  ;;  %v132_v26 = vld [vmem:[#allocation7 + $0x30] sm:$0xff]  ;;  %v131_v27 = vld [vmem:[#allocation7 + $0x28] sm:$0xff]  ;;  %v130_v28 = vld [vmem:[#allocation7 + $0x20] sm:$0xff] }
  0x18   :  { %v129_v29 = vld [vmem:[#allocation7 + $0x18] sm:$0xff]  ;;  %v128_v30 = vld [vmem:[#allocation7 + $0x10] sm:$0xff]  ;;  %v127_v31 = vld [vmem:[#allocation7 + $0x8] sm:$0xff] }
  0x19   :  { %92 = vmatpush.msra.mxu0 %v77_v5  ;;  %148 = vmatpush.msra.mxu1 %v139_v19  ;;  %v126_v32 = vld [vmem:[#allocation7] sm:$0xff]  ;;  %v192_v33 = vld [vmem:[%s356_s2] ss:$0 sm:$0xff] }
  0x1a   :  { %v193_v49 = vld [vmem:[%s358_s4] ss:$0 sm:$0xff] }
  0x1b   :  { %93 = vmatpush.msra.mxu0 %v76_v6  ;;  %149 = vmatpush.msra.mxu1 %v138_v20 }
  0x1d   :  { %94 = vmatpush.msra.mxu0 %v75_v7  ;;  %150 = vmatpush.msra.mxu1 %v137_v21 }
  0x1f   :  { %95 = vmatpush.msra.mxu0 %v74_v8  ;;  %151 = vmatpush.msra.mxu1 %v136_v22 }
  0x21   :  { %96 = vmatpush.msra.mxu0 %v73_v9  ;;  %152 = vmatpush.msra.mxu1 %v135_v23 }
  0x23   :  { %97 = vmatpush.msra.mxu0 %v72_v10  ;;  %153 = vmatpush.msra.mxu1 %v134_v24 }
  0x25   :  { %98 = vmatpush.msra.mxu0 %v71_v11  ;;  %154 = vmatpush.msra.mxu1 %v133_v25 }
  0x27   :  { %99 = vmatpush.msra.mxu0 %v70_v12  ;;  %155 = vmatpush.msra.mxu1 %v132_v26 }
  0x29   :  { %100 = vmatpush.msra.mxu0 %v69_v13  ;;  %156 = vmatpush.msra.mxu1 %v131_v27 }
  0x2b   :  { %101 = vmatpush.msra.mxu0 %v68_v14  ;;  %157 = vmatpush.msra.mxu1 %v130_v28 }
  0x2d   :  { %102 = vmatpush.msra.mxu0 %v67_v15  ;;  %158 = vmatpush.msra.mxu1 %v129_v29 }
  0x2e   :  { %103 = vmatmul.f32.vlgmr.msra.gmra.mxu0 %v66_v16 }
  0x2f   :  { %159 = vmatpush.msra.mxu1 %v128_v30 }
  0x31   :  { %160 = vmatpush.msra.mxu1 %v127_v31 }
  0x33   :  { %161 = vmatpush.msra.mxu1 %v126_v32 }
  0xab   :  { %v104_v34 = vpop.f32.mrf.mxu0 }
  0xac   :  { %v105_v35 = vadd.f32 %v192_v33, %v104_v34 }
  0xae   :  { %v185_v36 = vmul.f32 -1.442695, %v105_v35 }
  0xb0   :  { %194 = vpow2.f32 %v185_v36 }
  0xb6   :  { %v195_v37 = vpop.eup %194 }
  0xb7   :  { %v110_v38 = vadd.f32 1.0, %v195_v37 }
  0xb9   :  { %196 = vrcp.f32 %v110_v38  ;;  %v122_v42 = vand.u32 2147483648, %v110_v38  ;;  %v120_v44 = vand.u32 2147483647, %v110_v38  ;;  %vm116_vm1 = vweird.f32 %v110_v38 }
  0xbb   :  { %v123_v46 = vor.u32 1.1754944e-38, %v122_v42  ;;  %vm121_vm3 = vcmp.eq.f32.partialorder %v120_v44, 8.507059e+37 }
  0xbf   :  { %v197_v39 = vpop.eup %196 }
  0xc0   :  { %v112_v40 = vmul.f32 %v197_v39, %v110_v38  ;;  %vm117_vm0 = vweird.f32 %v197_v39 }
  0xc1   :  { %vm118_vm2 = vmor %vm116_vm1, %vm117_vm0 }
  0xc2   :  { %v113_v41 = vsub.f32 1.0, %v112_v40 }
  0xc4   :  { %v114_v43 = vmul.f32 %v197_v39, %v113_v41 }
  0xc6   :  { %v115_v45 = vadd.f32 %v197_v39, %v114_v43 }
  0xc8   :  { %v119_v47 = vsel %vm118_vm2, %v197_v39, %v115_v45 }
  0xc9   :  { %v124_v48 = vsel %vm121_vm3, %v123_v46, %v119_v47 }
  0xca   :  { %162 = vmatmul.f32.vlgmr.msra.gmra.mxu1 %v124_v48 }
 0x147   :  { %v163_v50 = vpop.f32.mrf.mxu1 }
 0x148   :  { %v164_v51 = vadd.f32 %v193_v49, %v163_v50 }
 0x14a   :  { %166 = vst [vmem:[#allocation8] sm:$0xff] %v164_v51 }
 0x14b   :  { %177 = dma.vmem_to_hbm [thread:$0]  %s173_s11, 128, %s175_s14, [#allocation4]  }
 0x14c   :  { %298 = dma.done.wait [#allocation4], 128  }
 0x14d   :  { %299 = vsyncadd [#allocation4], 4294967168 }
 0x14e   :  { %182 = vsyncpa [#allocation3], 1 }
 0x14f   :  { %183 = vsyncpa [#allocation6], 1 }
 0x150   :  { %184 = vsyncpa [#allocation4], 1 }

// kernel: tpu_custom_call.1
= control target key start
LH: loop header
LB: loop body
LE: loop exit
PB: predicated region body
PF: predicated region fallthrough
CT: control target
= control target key end

     0   :  { %10 = vsyncpa [#allocation3], 0  ;;  %s354_s0 = inlined_call_operand.hbm [shape: f32[8,128], index: 0, kind: input, shape index: {}]   ;;  %s355_s1 = inlined_call_operand.hbm [shape: f32[128,128], index: 1, kind: input, shape index: {}]   ;;  %s356_s2 = inlined_call_operand.vmem [shape: f32[1,128], index: 2, kind: input, shape index: {}]   ;;  %s357_s3 = inlined_call_operand.hbm [shape: f32[128,128], index: 3, kind: input, shape index: {}]   ;;  %s358_s4 = inlined_call_operand.vmem [shape: f32[1,128], index: 4, kind: input, shape index: {}]   ;;  %s359_s5 = inlined_call_operand.hbm [shape: f32[8,128], index: 5, kind: output, shape index: {}]  }
   0x1   :  { %11 = vsyncpa [#allocation6], 0  ;;  %s28_s20 = sshll.u32 %s355_s1, 4  ;;  %s29_s20 = int_to_ptr.hbm [resolvable:$true] %s28_s20 }
   0x2   :  { %12 = vsyncpa [#allocation4], 0  ;;  %s300_s21 = smov [#allocation5]   ;;  %s18_s25 = sshll.u32 %s354_s0, 4  ;;  %s19_s25 = int_to_ptr.hbm [resolvable:$true] %s18_s25 }
   0x3   :  { %s30_s22 = sshll.u32 %s300_s21, 4  ;;  %s301_s26 = smov 128   ;;  %s31_s22 = int_to_ptr.vmem [resolvable:$true] %s30_s22 }
   0x4   :  { %s302_s27 = smov 8   ;;  %s303_s28 = smov [#allocation2]  }
   0x5   :  { %36 = dma.hbm_to_vmem [thread:$0]  %s29_s20, 2048, %s31_s22, [#allocation6], %s301_s26, %s301_s26, %s302_s27  }
   0x6   :  { %s20_s29 = sshll.u32 %s303_s28, 4  ;;  %s43_s7 = sshll.u32 %s357_s3, 4  ;;  %s21_s29 = int_to_ptr.vmem [resolvable:$true] %s20_s29  ;;  %s44_s7 = int_to_ptr.hbm [resolvable:$true] %s43_s7 }
   0x7   :  { %23 = dma.hbm_to_vmem [thread:$0]  %s19_s25, 128, %s21_s29, [#allocation3]  }
   0x8   :  { %s304_s1 = smov [#allocation7]  }
   0x9   :  { %s45_s8 = sshll.u32 %s304_s1, 4  ;;  %s46_s8 = int_to_ptr.vmem [resolvable:$true] %s45_s8 }
   0xa   :  { %51 = dma.hbm_to_vmem [thread:$0]  %s44_s7, 2048, %s46_s8, [#allocation6], %s301_s26, %s301_s26, %s302_s27  }
   0xb   :  { %294 = dma.done.wait [#allocation3], 128  }
   0xc   :  { %295 = vsyncadd [#allocation3], 4294967168 }
   0xd   :  { %296 = dma.done.wait [#allocation6], 4096  }
   0xe   :  { %297 = vsyncadd [#allocation6], 4294963200  ;;  %v82_v0 = vld [vmem:[#allocation5 + $0x78] sm:$0xff]  ;;  %v81_v1 = vld [vmem:[#allocation5 + $0x70] sm:$0xff]  ;;  %s305_s10 = smov [#allocation8]   ;;  %s174_s14 = sshll.u32 %s359_s5, 4  ;;  %s175_s14 = int_to_ptr.hbm [resolvable:$true] %s174_s14 }
   0xf   :  { %87 = vmatpush.msra.mxu0 %v82_v0  ;;  %v80_v2 = vld [vmem:[#allocation5 + $0x68] sm:$0xff]  ;;  %v79_v3 = vld [vmem:[#allocation5 + $0x60] sm:$0xff]  ;;  %v78_v4 = vld [vmem:[#allocation5 + $0x58] sm:$0xff]  ;;  %s172_s11 = sshll.u32 %s305_s10, 4  ;;  %s173_s11 = int_to_ptr.vmem [resolvable:$true] %s172_s11 }
  0x10   :  { %v77_v5 = vld [vmem:[#allocation5 + $0x50] sm:$0xff]  ;;  %v76_v6 = vld [vmem:[#allocation5 + $0x48] sm:$0xff]  ;;  %v75_v7 = vld [vmem:[#allocation5 + $0x40] sm:$0xff] }
  0x11   :  { %88 = vmatpush.msra.mxu0 %v81_v1  ;;  %v74_v8 = vld [vmem:[#allocation5 + $0x38] sm:$0xff]  ;;  %v73_v9 = vld [vmem:[#allocation5 + $0x30] sm:$0xff]  ;;  %v72_v10 = vld [vmem:[#allocation5 + $0x28] sm:$0xff] }
  0x12   :  { %v71_v11 = vld [vmem:[#allocation5 + $0x20] sm:$0xff]  ;;  %v70_v12 = vld [vmem:[#allocation5 + $0x18] sm:$0xff]  ;;  %v69_v13 = vld [vmem:[#allocation5 + $0x10] sm:$0xff] }
  0x13   :  { %89 = vmatpush.msra.mxu0 %v80_v2  ;;  %v68_v14 = vld [vmem:[#allocation5 + $0x8] sm:$0xff]  ;;  %v67_v15 = vld [vmem:[#allocation5] sm:$0xff]  ;;  %v66_v16 = vld [vmem:[#allocation2] sm:$0xff] }
  0x14   :  { %v141_v17 = vld [vmem:[#allocation7 + $0x78] sm:$0xff]  ;;  %v140_v18 = vld [vmem:[#allocation7 + $0x70] sm:$0xff]  ;;  %v139_v19 = vld [vmem:[#allocation7 + $0x68] sm:$0xff] }
  0x15   :  { %90 = vmatpush.msra.mxu0 %v79_v3  ;;  %146 = vmatpush.msra.mxu1 %v141_v17  ;;  %v138_v20 = vld [vmem:[#allocation7 + $0x60] sm:$0xff]  ;;  %v137_v21 = vld [vmem:[#allocation7 + $0x58] sm:$0xff]  ;;  %v136_v22 = vld [vmem:[#allocation7 + $0x50] sm:$0xff] }
  0x16   :  { %v135_v23 = vld [vmem:[#allocation7 + $0x48] sm:$0xff]  ;;  %v134_v24 = vld [vmem:[#allocation7 + $0x40] sm:$0xff]  ;;  %v133_v25 = vld [vmem:[#allocation7 + $0x38] sm:$0xff] }
  0x17   :  { %91 = vmatpush.msra.mxu0 %v78_v4  ;;  %147 = vmatpush.msra.mxu1 %v140_v18  ;;  %v132_v26 = vld [vmem:[#allocation7 + $0x30] sm:$0xff]  ;;  %v131_v27 = vld [vmem:[#allocation7 + $0x28] sm:$0xff]  ;;  %v130_v28 = vld [vmem:[#allocation7 + $0x20] sm:$0xff] }
  0x18   :  { %v129_v29 = vld [vmem:[#allocation7 + $0x18] sm:$0xff]  ;;  %v128_v30 = vld [vmem:[#allocation7 + $0x10] sm:$0xff]  ;;  %v127_v31 = vld [vmem:[#allocation7 + $0x8] sm:$0xff] }
  0x19   :  { %92 = vmatpush.msra.mxu0 %v77_v5  ;;  %148 = vmatpush.msra.mxu1 %v139_v19  ;;  %v126_v32 = vld [vmem:[#allocation7] sm:$0xff]  ;;  %v192_v33 = vld [vmem:[%s356_s2] ss:$0 sm:$0xff] }
  0x1a   :  { %v193_v49 = vld [vmem:[%s358_s4] ss:$0 sm:$0xff] }
  0x1b   :  { %93 = vmatpush.msra.mxu0 %v76_v6  ;;  %149 = vmatpush.msra.mxu1 %v138_v20 }
  0x1d   :  { %94 = vmatpush.msra.mxu0 %v75_v7  ;;  %150 = vmatpush.msra.mxu1 %v137_v21 }
  0x1f   :  { %95 = vmatpush.msra.mxu0 %v74_v8  ;;  %151 = vmatpush.msra.mxu1 %v136_v22 }
  0x21   :  { %96 = vmatpush.msra.mxu0 %v73_v9  ;;  %152 = vmatpush.msra.mxu1 %v135_v23 }
  0x23   :  { %97 = vmatpush.msra.mxu0 %v72_v10  ;;  %153 = vmatpush.msra.mxu1 %v134_v24 }
  0x25   :  { %98 = vmatpush.msra.mxu0 %v71_v11  ;;  %154 = vmatpush.msra.mxu1 %v133_v25 }
  0x27   :  { %99 = vmatpush.msra.mxu0 %v70_v12  ;;  %155 = vmatpush.msra.mxu1 %v132_v26 }
  0x29   :  { %100 = vmatpush.msra.mxu0 %v69_v13  ;;  %156 = vmatpush.msra.mxu1 %v131_v27 }
  0x2b   :  { %101 = vmatpush.msra.mxu0 %v68_v14  ;;  %157 = vmatpush.msra.mxu1 %v130_v28 }
  0x2d   :  { %102 = vmatpush.msra.mxu0 %v67_v15  ;;  %158 = vmatpush.msra.mxu1 %v129_v29 }
  0x2e   :  { %103 = vmatmul.f32.vlgmr.msra.gmra.mxu0 %v66_v16 }
  0x2f   :  { %159 = vmatpush.msra.mxu1 %v128_v30 }
  0x31   :  { %160 = vmatpush.msra.mxu1 %v127_v31 }
  0x33   :  { %161 = vmatpush.msra.mxu1 %v126_v32 }
  0xab   :  { %v104_v34 = vpop.f32.mrf.mxu0 }
  0xac   :  { %v105_v35 = vadd.f32 %v192_v33, %v104_v34 }
  0xae   :  { %v185_v36 = vmul.f32 -1.442695, %v105_v35 }
  0xb0   :  { %194 = vpow2.f32 %v185_v36 }
  0xb6   :  { %v195_v37 = vpop.eup %194 }
  0xb7   :  { %v110_v38 = vadd.f32 1.0, %v195_v37 }
  0xb9   :  { %196 = vrcp.f32 %v110_v38  ;;  %v122_v42 = vand.u32 2147483648, %v110_v38  ;;  %v120_v44 = vand.u32 2147483647, %v110_v38  ;;  %vm116_vm1 = vweird.f32 %v110_v38 }
  0xbb   :  { %v123_v46 = vor.u32 1.1754944e-38, %v122_v42  ;;  %vm121_vm3 = vcmp.eq.f32.partialorder %v120_v44, 8.507059e+37 }
  0xbf   :  { %v197_v39 = vpop.eup %196 }
  0xc0   :  { %v112_v40 = vmul.f32 %v197_v39, %v110_v38  ;;  %vm117_vm0 = vweird.f32 %v197_v39 }
  0xc1   :  { %vm118_vm2 = vmor %vm116_vm1, %vm117_vm0 }
  0xc2   :  { %v113_v41 = vsub.f32 1.0, %v112_v40 }
  0xc4   :  { %v114_v43 = vmul.f32 %v197_v39, %v113_v41 }
  0xc6   :  { %v115_v45 = vadd.f32 %v197_v39, %v114_v43 }
  0xc8   :  { %v119_v47 = vsel %vm118_vm2, %v197_v39, %v115_v45 }
  0xc9   :  { %v124_v48 = vsel %vm121_vm3, %v123_v46, %v119_v47 }
  0xca   :  { %162 = vmatmul.f32.vlgmr.msra.gmra.mxu1 %v124_v48 }
 0x147   :  { %v163_v50 = vpop.f32.mrf.mxu1 }
 0x148   :  { %v164_v51 = vadd.f32 %v193_v49, %v163_v50 }
 0x14a   :  { %166 = vst [vmem:[#allocation8] sm:$0xff] %v164_v51 }
 0x14b   :  { %177 = dma.vmem_to_hbm [thread:$0]  %s173_s11, 128, %s175_s14, [#allocation4]  }
 0x14c   :  { %298 = dma.done.wait [#allocation4], 128  }
 0x14d   :  { %299 = vsyncadd [#allocation4], 4294967168 }
 0x14e   :  { %182 = vsyncpa [#allocation3], 1 }
 0x14f   :  { %183 = vsyncpa [#allocation6], 1 }
 0x150   :  { %184 = vsyncpa [#allocation4], 1 }

</bundles_post_ra>
